<compile_context>
chip_gen: v5e
topology: v5e:2x2
jax: 0.10.0
libtpu: 0.0.40
codegen_flags: <defaults>
</compile_context>

<pallas_src>
import functools

import jax
import jax.numpy as jnp
from jax.experimental import pallas as pl
from jax.experimental.pallas import tpu as pltpu


def _triple(v):
    return (v, v, v) if isinstance(v, int) else tuple(v)


def _softplus(x):
    # Stable softplus: log1p(exp(x)) overflows for x >~ 88 in f32.
    return jnp.maximum(x, 0.0) + jnp.log1p(jnp.exp(-jnp.abs(x)))


def _ds(start, size, stride):
    return pl.ds(start, size) if stride == 1 else pl.ds(start, size, stride)


# ------------------------- weight sampling kernel -------------------------

def _sample_kernel(mu_ref, rho_ref, eps_ref, out_ref):
    # TrainableDistribution.sample(): w = mu + softplus(rho) * eps (stable form).
    rho = rho_ref[...]
    sigma = jnp.maximum(rho, 0.0) + jnp.log1p(jnp.exp(-jnp.abs(rho)))
    out_ref[...] = mu_ref[...] + sigma * eps_ref[...]


def sample_gaussian(mu2d, rho2d, eps2d):
    """Reparameterized sample; row-tiled so large conv weights never overflow VMEM."""
    r, c = mu2d.shape
    # ~2 MiB per f32 block; 4 operands x 2 pipeline buffers stays well under the
    # 16/32 MiB default scoped-VMEM limits of v5e/v6e/v7x.
    rb = max(1, (2 * 1024 * 1024) // (4 * c))
    if rb >= 8:
        rb = (rb // 8) * 8
    rb = min(r, rb)
    return pl.pallas_call(
        _sample_kernel,
        out_shape=jax.ShapeDtypeStruct((r, c), mu2d.dtype),
        grid_spec=pltpu.PrefetchScalarGridSpec(
            num_scalar_prefetch=0,
            grid=(pl.cdiv(r, rb),),
            in_specs=[pl.BlockSpec((rb, c), lambda i: (i, 0)) for _ in range(3)],
            out_specs=pl.BlockSpec((rb, c), lambda i: (i, 0)),
        ),
        compiler_params=pltpu.CompilerParams(
            dimension_semantics=("parallel",)),
    )(mu2d, rho2d, eps2d)


# ------------------------- fused conv3d kernel -------------------------

def _conv3d_kernel(x_ref, w_ref, b_ref, o_ref, *,
                   kh, kw, sh, sw, dh, dw, ho, wo, cin, cout):
    # x_ref: (Hp, Wp, Cin)  bf16 -- one padded depth-slab of the input.
    # w_ref: (kh, kw, Cout, Cin) bf16 -- weight taps for the current kd offset.
    # b_ref: (1, Cout, 1)   f32.
    # o_ref: (Ho, Cout, Wo) f32 -- resident across the kd ("arbitrary") grid axis.
    kd_i = pl.program_id(2)

    @pl.when(kd_i == 0)
    def _init():
        o_ref[...] = jnp.broadcast_to(b_ref[...], o_ref.shape)

    # Load all taps once per grid step; slicing the leading (kh, kw) dims of a
    # value keeps the minor (Cout, Cin) tile intact -> no relayout, and no
    # repeated VMEM loads inside the row loop.
    w_all = w_ref[...]                              # (kh, kw, Cout, Cin)

    @pl.loop(0, ho)
    def _row(j):
        acc = jnp.zeros((cout, wo), jnp.float32)
        for ikh in range(kh):
            for ikw in range(kw):
                patch = x_ref[pl.ds(ikh * dh + j * sh, 1),
                              _ds(ikw * dw, wo, sw), :]
                patch = patch.reshape(wo, cin)      # drop leading unit dim (layout no-op)
                w_tap = w_all[ikh, ikw]             # (Cout, Cin)
                acc = acc + jax.lax.dot_general(
                    w_tap, patch,
                    dimension_numbers=(((1,), (1,)), ((), ())),
                    preferred_element_type=jnp.float32)
        o_ref[pl.ds(j, 1)] = o_ref[pl.ds(j, 1)] + acc[None, :, :]


def conv3d_pallas(x, weight, bias, stride, padding, dilation):
    """x: (N, Cin, D, H, W); weight: (Cout, Cin, kD, kH, kW); bias: (Cout,) or None."""
    n, cin, d, h, w = x.shape
    cout, _, kd, kh, kw = weight.shape
    sd, sh, sw = stride
    pd, ph, pw = padding
    dd, dh, dw = dilation

    dp, hp, wp = d + 2 * pd, h + 2 * ph, w + 2 * pw
    do = (dp - dd * (kd - 1) - 1) // sd + 1
    ho = (hp - dh * (kh - 1) - 1) // sh + 1
    wo = (wp - dw * (kw - 1) - 1) // sw + 1

    # Channels-last + zero-pad + bf16 cast: one fused XLA pass over x
    # (replaces the 27x im2col blow-up + pad + transposes of the naive path).
    xp = jnp.pad(jnp.transpose(x, (0, 2, 3, 4, 1)),
                 ((0, 0), (pd, pd), (ph, ph), (pw, pw), (0, 0))).astype(jnp.bfloat16)
    # (kd, kh, kw, Cout, Cin) so each per-tap matmul is (Cout,Cin) x (Wo,Cin)^T.
    wt = jnp.transpose(weight, (2, 3, 4, 0, 1)).astype(jnp.bfloat16)
    if bias is None:
        b3 = jnp.zeros((1, cout, 1), jnp.float32)
    else:
        b3 = bias.astype(jnp.float32).reshape(1, cout, 1)

    kernel = functools.partial(
        _conv3d_kernel, kh=kh, kw=kw, sh=sh, sw=sw, dh=dh, dw=dw,
        ho=ho, wo=wo, cin=cin, cout=cout)

    out = pl.pallas_call(
        kernel,
        out_shape=jax.ShapeDtypeStruct((n, do, ho, cout, wo), jnp.float32),
        grid_spec=pltpu.PrefetchScalarGridSpec(
            num_scalar_prefetch=0,
            grid=(n, do, kd),                      # kd last: reduction axis
            in_specs=[
                pl.BlockSpec((None, None, hp, wp, cin),
                             lambda b, i, k: (b, i * sd + k * dd, 0, 0, 0)),
                pl.BlockSpec((None, kh, kw, cout, cin),
                             lambda b, i, k: (k, 0, 0, 0, 0)),
                pl.BlockSpec((1, cout, 1),
                             lambda b, i, k: (0, 0, 0)),
            ],
            out_specs=pl.BlockSpec((None, None, ho, cout, wo),
                                   lambda b, i, k: (b, i, 0, 0, 0)),
        ),
        compiler_params=pltpu.CompilerParams(
            dimension_semantics=("parallel", "parallel", "arbitrary"),
            vmem_limit_bytes=64 * 1024 * 1024,
        ),
    )(xp, wt, b3)

    # (N, Do, Ho, Cout, Wo) -> (N, Cout, Do, Ho, Wo); minor (lane) axis untouched.
    return jnp.transpose(out, (0, 3, 1, 2, 4)).astype(x.dtype)


# ------------------------- BayesConv3d module -------------------------

class BayesConv3dPallas:
    def __init__(self, in_channels, out_channels, kernel_size, stride=1, padding=0,
                 dilation=1, prior_sigma_1=0.1, prior_sigma_2=0.002, prior_pi=1.0,
                 mu_init=0.0, sigma_init=10.0, frozen=False, groups=1, bias=True,
                 padding_mode="zeros", *, key):
        assert groups == 1        # TODO(synk): grouped conv not implemented (needs per-group matmuls).
        assert padding_mode == "zeros"  # TODO(synk): reflect/replicate/circular padding not implemented.
        self.in_channels = in_channels
        self.out_channels = out_channels
        self.kernel_size = _triple(kernel_size)
        self.stride = _triple(stride)
        self.padding = _triple(padding)
        self.dilation = _triple(dilation)
        self.frozen = frozen
        self.has_bias = bias

        k1, k2, k3, k4 = jax.random.split(key, 4)
        wshape = (out_channels, in_channels // groups, *self.kernel_size)
        # reset_parameters(): normal(mu_init, 0.1) / normal(sigma_init, 0.1)
        self.weight_mu = mu_init + 0.1 * jax.random.normal(k1, wshape, jnp.float32)
        self.weight_sigma = sigma_init + 0.1 * jax.random.normal(k2, wshape, jnp.float32)
        if bias:
            self.bias_mu = mu_init + 0.1 * jax.random.normal(k3, (out_channels,), jnp.float32)
            self.bias_sigma = sigma_init + 0.1 * jax.random.normal(k4, (out_channels,), jnp.float32)
        else:
            self.bias_mu = None
            self.bias_sigma = None

    def sample(self, key):
        """Sample the posterior (weight via Pallas elementwise kernel, bias via jnp)."""
        kw_, kb_ = jax.random.split(key)
        eps_w = jax.random.normal(kw_, self.weight_mu.shape, jnp.float32)
        w2 = sample_gaussian(
            self.weight_mu.reshape(self.out_channels, -1),
            self.weight_sigma.reshape(self.out_channels, -1),
            eps_w.reshape(self.out_channels, -1))
        weight = w2.reshape(self.weight_mu.shape)
        if self.has_bias:
            eps_b = jax.random.normal(kb_, (self.out_channels,), jnp.float32)
            # (Cout,) sample: plain jnp -- a dedicated pallas_call here is pure overhead.
            bias = self.bias_mu + _softplus(self.bias_sigma) * eps_b
        else:
            bias = None
        return weight, bias

    def __call__(self, x, *, key):
        if self.frozen:
            weight, bias = self.weight_mu, self.bias_mu
        else:
            weight, bias = self.sample(key)
            # TODO(synk): lprior / lvposterior (Gaussian-mixture prior & posterior
            # log-probs) are attribute side effects in the PyTorch module, not part
            # of the returned tensor; not computed here.
        return conv3d_pallas(x, weight, bias, self.stride, self.padding, self.dilation)


# ------------------------- demo / self-check -------------------------

if __name__ == "__main__":
    root = jax.random.PRNGKey(0)
    k_init, k_x, k_fwd = jax.random.split(root, 3)

    N, Cin, Cout = 2, 4, 8
    D = H = W = 8
    layer = BayesConv3dPallas(Cin, Cout, kernel_size=3, stride=1, padding=1,
                              dilation=1, bias=True, key=k_init)

    x = jax.random.normal(k_x, (N, Cin, D, H, W), jnp.float32)

    fwd = jax.jit(lambda xx, kk: layer(xx, key=kk))
    out = jax.block_until_ready(fwd(x, k_fwd))
    assert out.shape == (N, Cout, D, H, W), out.shape

    # Reference: same Pallas-sampled weight/bias, XLA conv3d at the same bf16
    # operand precision with f32 accumulation.
    w_s, b_s = layer.sample(k_fwd)
    ref = jax.lax.conv_general_dilated(
        x.astype(jnp.bfloat16), w_s.astype(jnp.bfloat16),
        window_strides=(1, 1, 1), padding=((1, 1), (1, 1), (1, 1)),
        rhs_dilation=(1, 1, 1),
        dimension_numbers=("NCDHW", "OIDHW", "NCDHW"),
        preferred_element_type=jnp.float32)
    ref = ref + b_s[None, :, None, None, None]
    err = float(jnp.max(jnp.abs(out - ref)))
    assert jnp.allclose(out, ref, rtol=5e-3, atol=5e-2), err

    print("KERNEL_OK")
</pallas_src>

<mosaic_0001>
module attributes {stable_mosaic.version = 11 : i64} {
  func.func @_sample_kernel(%arg0: i32, %arg1: memref<8x108xf32, #tpu.memory_space<vmem>>, %arg2: memref<8x108xf32, #tpu.memory_space<vmem>>, %arg3: memref<8x108xf32, #tpu.memory_space<vmem>>, %arg4: memref<8x108xf32, #tpu.memory_space<vmem>>) attributes {dimension_semantics = [#tpu.dimension_semantics<parallel>], iteration_bounds = array<i64: 1>, scalar_prefetch = 0 : i64, scratch_operands = 0 : i64, tpu.core_type = #tpu.core_type<tc>, window_params = [{transform_indices = @transform_0, window_bounds = array<i64: 8, 108>}, {transform_indices = @transform_1, window_bounds = array<i64: 8, 108>}, {transform_indices = @transform_2, window_bounds = array<i64: 8, 108>}, {transform_indices = @transform_3, window_bounds = array<i64: 8, 108>}]} {
    %c0 = arith.constant 0 : index
    %c0_0 = arith.constant 0 : index
    %0 = vector.load %arg2[%c0, %c0_0] : memref<8x108xf32, #tpu.memory_space<vmem>>, vector<8x108xf32>
    %cst = arith.constant 0.000000e+00 : f32
    %1 = vector.broadcast %cst : f32 to vector<8x108xf32>
    %2 = arith.maximumf %0, %1 : vector<8x108xf32>
    %3 = math.absf %0 : vector<8x108xf32>
    %cst_1 = arith.constant 0.000000e+00 : f32
    %4 = vector.broadcast %cst_1 : f32 to vector<8x108xf32>
    %5 = arith.subf %4, %3 : vector<8x108xf32>
    %6 = math.exp %5 : vector<8x108xf32>
    %7 = math.log1p %6 : vector<8x108xf32>
    %8 = arith.addf %2, %7 : vector<8x108xf32>
    %c0_2 = arith.constant 0 : index
    %c0_3 = arith.constant 0 : index
    %9 = vector.load %arg1[%c0_2, %c0_3] : memref<8x108xf32, #tpu.memory_space<vmem>>, vector<8x108xf32>
    %c0_4 = arith.constant 0 : index
    %c0_5 = arith.constant 0 : index
    %10 = vector.load %arg3[%c0_4, %c0_5] : memref<8x108xf32, #tpu.memory_space<vmem>>, vector<8x108xf32>
    %11 = arith.mulf %8, %10 : vector<8x108xf32>
    %12 = arith.addf %9, %11 : vector<8x108xf32>
    %c0_6 = arith.constant 0 : index
    %c0_7 = arith.constant 0 : index
    %13 = vector.load %arg4[%c0_6, %c0_7] : memref<8x108xf32, #tpu.memory_space<vmem>>, vector<8x108xf32>
    tpu.vector_store %arg4[%c0_6, %c0_7], %12 {strides = array<i32>} : memref<8x108xf32, #tpu.memory_space<vmem>>, vector<8x108xf32>,
    return
  }
  func.func @transform_0(%arg0: i32) -> (i32, i32) {
    %c0_i32 = arith.constant 0 : i32
    %c0_i32_0 = arith.constant 0 : i32
    return %arg0, %c0_i32 : i32, i32
  }
  func.func @transform_1(%arg0: i32) -> (i32, i32) {
    %c0_i32 = arith.constant 0 : i32
    %c0_i32_0 = arith.constant 0 : i32
    return %arg0, %c0_i32 : i32, i32
  }
  func.func @transform_2(%arg0: i32) -> (i32, i32) {
    %c0_i32 = arith.constant 0 : i32
    %c0_i32_0 = arith.constant 0 : i32
    return %arg0, %c0_i32 : i32, i32
  }
  func.func @transform_3(%arg0: i32) -> (i32, i32) {
    %c0_i32 = arith.constant 0 : i32
    %c0_i32_0 = arith.constant 0 : i32
    return %arg0, %c0_i32 : i32, i32
  }
}

module attributes {stable_mosaic.version = 11 : i64} {
  func.func @_conv3d_kernel(%arg0: i32, %arg1: i32, %arg2: i32, %arg3: memref<1x1x10x10x4xbf16, #tpu.memory_space<vmem>>, %arg4: memref<1x3x3x8x4xbf16, #tpu.memory_space<vmem>>, %arg5: memref<1x8x1xf32, #tpu.memory_space<vmem>>, %arg6: memref<1x1x8x8x8xf32, #tpu.memory_space<vmem>>) attributes {dimension_semantics = [#tpu.dimension_semantics<parallel>, #tpu.dimension_semantics<parallel>, #tpu.dimension_semantics<arbitrary>], iteration_bounds = array<i64: 2, 8, 3>, scalar_prefetch = 0 : i64, scratch_operands = 0 : i64, tpu.core_type = #tpu.core_type<tc>, window_params = [{transform_indices = @transform_0, window_bounds = array<i64: 1, 1, 10, 10, 4>}, {transform_indices = @transform_1, window_bounds = array<i64: 1, 3, 3, 8, 4>}, {pipeline_mode = #tpu.pipeline_mode<synchronous>, transform_indices = @transform_2, window_bounds = array<i64: 1, 8, 1>}, {transform_indices = @transform_3, window_bounds = array<i64: 1, 1, 8, 8, 8>}]} {
    %c0_i32 = arith.constant 0 : i32
    %0 = arith.cmpi eq, %arg2, %c0_i32 : i32
    %1 = arith.extui %0 : i1 to i32
    %c0_i32_0 = arith.constant 0 : i32
    %2 = arith.cmpi ne, %1, %c0_i32_0 : i32
    scf.if %2 {
      %c0_7 = arith.constant 0 : index
      %c0_8 = arith.constant 0 : index
      %c0_9 = arith.constant 0 : index
      %6 = vector.load %arg5[%c0_7, %c0_8, %c0_9] : memref<1x8x1xf32, #tpu.memory_space<vmem>>, vector<1x8x1xf32>
      %7 = vector.shape_cast %6 : vector<1x8x1xf32> to vector<1x8x1xf32>
      %8 = vector.broadcast %7 : vector<1x8x1xf32> to vector<8x8x8xf32>
      %c0_10 = arith.constant 0 : index
      %c0_11 = arith.constant 0 : index
      %c0_12 = arith.constant 0 : index
      %c0_13 = arith.constant 0 : index
      %c0_14 = arith.constant 0 : index
      %9 = vector.load %arg6[%c0_10, %c0_11, %c0_12, %c0_13, %c0_14] : memref<1x1x8x8x8xf32, #tpu.memory_space<vmem>>, vector<1x1x8x8x8xf32>
      %10 = vector.shape_cast %9 : vector<1x1x8x8x8xf32> to vector<8x8x8xf32>
      %11 = vector.shape_cast %8 : vector<8x8x8xf32> to vector<1x1x8x8x8xf32>
      tpu.vector_store %arg6[%c0_10, %c0_11, %c0_12, %c0_13, %c0_14], %11 {strides = array<i32>} : memref<1x1x8x8x8xf32, #tpu.memory_space<vmem>>, vector<1x1x8x8x8xf32>,
    } else {
    }
    %c0 = arith.constant 0 : index
    %c0_1 = arith.constant 0 : index
    %c0_2 = arith.constant 0 : index
    %c0_3 = arith.constant 0 : index
    %c0_4 = arith.constant 0 : index
    %3 = vector.load %arg4[%c0, %c0_1, %c0_2, %c0_3, %c0_4] : memref<1x3x3x8x4xbf16, #tpu.memory_space<vmem>>, vector<1x3x3x8x4xbf16>
    %4 = vector.shape_cast %3 : vector<1x3x3x8x4xbf16> to vector<3x3x8x4xbf16>
    %c0_i32_5 = arith.constant 0 : i32
    %c8_i32 = arith.constant 8 : i32
    %5 = arith.addi %c0_i32_5, %c8_i32 : i32
    %c1_i32 = arith.constant 1 : i32
    scf.for %arg7 = %c0_i32_5 to %5 step %c1_i32  : i32 {
      %c1_i32_7 = arith.constant 1 : i32
      %6 = arith.muli %arg7, %c1_i32_7 : i32
      %c0_i32_8 = arith.constant 0 : i32
      %7 = arith.addi %c0_i32_8, %6 : i32
      %cst = arith.constant 0.000000e+00 : f32
      %8 = vector.broadcast %cst : f32 to vector<8x8xf32>
      %c1_i32_9 = arith.constant 1 : i32
      %9 = arith.muli %7, %c1_i32_9 : i32
      %c0_i32_10 = arith.constant 0 : i32
      %10 = arith.addi %c0_i32_10, %9 : i32
      %c0_11 = arith.constant 0 : index
      %c0_12 = arith.constant 0 : index
      %11 = arith.index_cast %10 : i32 to index
      %c0_13 = arith.constant 0 : index
      %c0_14 = arith.constant 0 : index
      %12 = vector.load %arg3[%c0_11, %c0_12, %11, %c0_13, %c0_14] : memref<1x1x10x10x4xbf16, #tpu.memory_space<vmem>>, vector<1x1x1x8x4xbf16>
      %13 = vector.shape_cast %12 : vector<1x1x1x8x4xbf16> to vector<1x8x4xbf16>
      %14 = vector.shape_cast %13 : vector<1x8x4xbf16> to vector<8x4xbf16>
      %15 = vector.extract_strided_slice %4 {offsets = [0, 0, 0, 0], sizes = [1, 1, 8, 4], strides = [1, 1, 1, 1]} : vector<3x3x8x4xbf16> to vector<1x1x8x4xbf16>
      %16 = vector.shape_cast %15 : vector<1x1x8x4xbf16> to vector<8x4xbf16>
      %cst_15 = arith.constant dense<0.000000e+00> : vector<8x8xf32>
      %17 = tpu.matmul %16, %14, %cst_15 {dimension_numbers = #tpu.dot_dimension_numbers<[1], [1], [0], [0], [0, 0, 1, 0], [], []>} : vector<8x4xbf16>, vector<8x4xbf16>, vector<8x8xf32> -> vector<8x8xf32>
      %18 = arith.addf %8, %17 : vector<8x8xf32>
      %c1_i32_16 = arith.constant 1 : i32
      %19 = arith.muli %7, %c1_i32_16 : i32
      %c0_i32_17 = arith.constant 0 : i32
      %20 = arith.addi %c0_i32_17, %19 : i32
      %c0_18 = arith.constant 0 : index
      %c0_19 = arith.constant 0 : index
      %21 = arith.index_cast %20 : i32 to index
      %c1 = arith.constant 1 : index
      %c0_20 = arith.constant 0 : index
      %22 = vector.load %arg3[%c0_18, %c0_19, %21, %c1, %c0_20] : memref<1x1x10x10x4xbf16, #tpu.memory_space<vmem>>, vector<1x1x1x8x4xbf16>
      %23 = vector.shape_cast %22 : vector<1x1x1x8x4xbf16> to vector<1x8x4xbf16>
      %24 = vector.shape_cast %23 : vector<1x8x4xbf16> to vector<8x4xbf16>
      %25 = vector.extract_strided_slice %4 {offsets = [0, 1, 0, 0], sizes = [1, 1, 8, 4], strides = [1, 1, 1, 1]} : vector<3x3x8x4xbf16> to vector<1x1x8x4xbf16>
      %26 = vector.shape_cast %25 : vector<1x1x8x4xbf16> to vector<8x4xbf16>
      %cst_21 = arith.constant dense<0.000000e+00> : vector<8x8xf32>
      %27 = tpu.matmul %26, %24, %cst_21 {dimension_numbers = #tpu.dot_dimension_numbers<[1], [1], [0], [0], [0, 0, 1, 0], [], []>} : vector<8x4xbf16>, vector<8x4xbf16>, vector<8x8xf32> -> vector<8x8xf32>
      %28 = arith.addf %18, %27 : vector<8x8xf32>
      %c1_i32_22 = arith.constant 1 : i32
      %29 = arith.muli %7, %c1_i32_22 : i32
      %c0_i32_23 = arith.constant 0 : i32
      %30 = arith.addi %c0_i32_23, %29 : i32
      %c0_24 = arith.constant 0 : index
      %c0_25 = arith.constant 0 : index
      %31 = arith.index_cast %30 : i32 to index
      %c2 = arith.constant 2 : index
      %c0_26 = arith.constant 0 : index
      %32 = vector.load %arg3[%c0_24, %c0_25, %31, %c2, %c0_26] : memref<1x1x10x10x4xbf16, #tpu.memory_space<vmem>>, vector<1x1x1x8x4xbf16>
      %33 = vector.shape_cast %32 : vector<1x1x1x8x4xbf16> to vector<1x8x4xbf16>
      %34 = vector.shape_cast %33 : vector<1x8x4xbf16> to vector<8x4xbf16>
      %35 = vector.extract_strided_slice %4 {offsets = [0, 2, 0, 0], sizes = [1, 1, 8, 4], strides = [1, 1, 1, 1]} : vector<3x3x8x4xbf16> to vector<1x1x8x4xbf16>
      %36 = vector.shape_cast %35 : vector<1x1x8x4xbf16> to vector<8x4xbf16>
      %cst_27 = arith.constant dense<0.000000e+00> : vector<8x8xf32>
      %37 = tpu.matmul %36, %34, %cst_27 {dimension_numbers = #tpu.dot_dimension_numbers<[1], [1], [0], [0], [0, 0, 1, 0], [], []>} : vector<8x4xbf16>, vector<8x4xbf16>, vector<8x8xf32> -> vector<8x8xf32>
      %38 = arith.addf %28, %37 : vector<8x8xf32>
      %c1_i32_28 = arith.constant 1 : i32
      %39 = arith.muli %7, %c1_i32_28 : i32
      %c1_i32_29 = arith.constant 1 : i32
      %40 = arith.addi %c1_i32_29, %39 : i32
      %c0_30 = arith.constant 0 : index
      %c0_31 = arith.constant 0 : index
      %41 = arith.index_cast %40 : i32 to index
      %c0_32 = arith.constant 0 : index
      %c0_33 = arith.constant 0 : index
      %42 = vector.load %arg3[%c0_30, %c0_31, %41, %c0_32, %c0_33] : memref<1x1x10x10x4xbf16, #tpu.memory_space<vmem>>, vector<1x1x1x8x4xbf16>
      %43 = vector.shape_cast %42 : vector<1x1x1x8x4xbf16> to vector<1x8x4xbf16>
      %44 = vector.shape_cast %43 : vector<1x8x4xbf16> to vector<8x4xbf16>
      %45 = vector.extract_strided_slice %4 {offsets = [1, 0, 0, 0], sizes = [1, 1, 8, 4], strides = [1, 1, 1, 1]} : vector<3x3x8x4xbf16> to vector<1x1x8x4xbf16>
      %46 = vector.shape_cast %45 : vector<1x1x8x4xbf16> to vector<8x4xbf16>
      %cst_34 = arith.constant dense<0.000000e+00> : vector<8x8xf32>
      %47 = tpu.matmul %46, %44, %cst_34 {dimension_numbers = #tpu.dot_dimension_numbers<[1], [1], [0], [0], [0, 0, 1, 0], [], []>} : vector<8x4xbf16>, vector<8x4xbf16>, vector<8x8xf32> -> vector<8x8xf32>
      %48 = arith.addf %38, %47 : vector<8x8xf32>
      %c1_i32_35 = arith.constant 1 : i32
      %49 = arith.muli %7, %c1_i32_35 : i32
      %c1_i32_36 = arith.constant 1 : i32
      %50 = arith.addi %c1_i32_36, %49 : i32
      %c0_37 = arith.constant 0 : index
      %c0_38 = arith.constant 0 : index
      %51 = arith.index_cast %50 : i32 to index
      %c1_39 = arith.constant 1 : index
      %c0_40 = arith.constant 0 : index
      %52 = vector.load %arg3[%c0_37, %c0_38, %51, %c1_39, %c0_40] : memref<1x1x10x10x4xbf16, #tpu.memory_space<vmem>>, vector<1x1x1x8x4xbf16>
      %53 = vector.shape_cast %52 : vector<1x1x1x8x4xbf16> to vector<1x8x4xbf16>
      %54 = vector.shape_cast %53 : vector<1x8x4xbf16> to vector<8x4xbf16>
      %55 = vector.extract_strided_slice %4 {offsets = [1, 1, 0, 0], sizes = [1, 1, 8, 4], strides = [1, 1, 1, 1]} : vector<3x3x8x4xbf16> to vector<1x1x8x4xbf16>
      %56 = vector.shape_cast %55 : vector<1x1x8x4xbf16> to vector<8x4xbf16>
      %cst_41 = arith.constant dense<0.000000e+00> : vector<8x8xf32>
      %57 = tpu.matmul %56, %54, %cst_41 {dimension_numbers = #tpu.dot_dimension_numbers<[1], [1], [0], [0], [0, 0, 1, 0], [], []>} : vector<8x4xbf16>, vector<8x4xbf16>, vector<8x8xf32> -> vector<8x8xf32>
      %58 = arith.addf %48, %57 : vector<8x8xf32>
      %c1_i32_42 = arith.constant 1 : i32
      %59 = arith.muli %7, %c1_i32_42 : i32
      %c1_i32_43 = arith.constant 1 : i32
      %60 = arith.addi %c1_i32_43, %59 : i32
      %c0_44 = arith.constant 0 : index
      %c0_45 = arith.constant 0 : index
      %61 = arith.index_cast %60 : i32 to index
      %c2_46 = arith.constant 2 : index
      %c0_47 = arith.constant 0 : index
      %62 = vector.load %arg3[%c0_44, %c0_45, %61, %c2_46, %c0_47] : memref<1x1x10x10x4xbf16, #tpu.memory_space<vmem>>, vector<1x1x1x8x4xbf16>
      %63 = vector.shape_cast %62 : vector<1x1x1x8x4xbf16> to vector<1x8x4xbf16>
      %64 = vector.shape_cast %63 : vector<1x8x4xbf16> to vector<8x4xbf16>
      %65 = vector.extract_strided_slice %4 {offsets = [1, 2, 0, 0], sizes = [1, 1, 8, 4], strides = [1, 1, 1, 1]} : vector<3x3x8x4xbf16> to vector<1x1x8x4xbf16>
      %66 = vector.shape_cast %65 : vector<1x1x8x4xbf16> to vector<8x4xbf16>
      %cst_48 = arith.constant dense<0.000000e+00> : vector<8x8xf32>
      %67 = tpu.matmul %66, %64, %cst_48 {dimension_numbers = #tpu.dot_dimension_numbers<[1], [1], [0], [0], [0, 0, 1, 0], [], []>} : vector<8x4xbf16>, vector<8x4xbf16>, vector<8x8xf32> -> vector<8x8xf32>
      %68 = arith.addf %58, %67 : vector<8x8xf32>
      %c1_i32_49 = arith.constant 1 : i32
      %69 = arith.muli %7, %c1_i32_49 : i32
      %c2_i32 = arith.constant 2 : i32
      %70 = arith.addi %c2_i32, %69 : i32
      %c0_50 = arith.constant 0 : index
      %c0_51 = arith.constant 0 : index
      %71 = arith.index_cast %70 : i32 to index
      %c0_52 = arith.constant 0 : index
      %c0_53 = arith.constant 0 : index
      %72 = vector.load %arg3[%c0_50, %c0_51, %71, %c0_52, %c0_53] : memref<1x1x10x10x4xbf16, #tpu.memory_space<vmem>>, vector<1x1x1x8x4xbf16>
      %73 = vector.shape_cast %72 : vector<1x1x1x8x4xbf16> to vector<1x8x4xbf16>
      %74 = vector.shape_cast %73 : vector<1x8x4xbf16> to vector<8x4xbf16>
      %75 = vector.extract_strided_slice %4 {offsets = [2, 0, 0, 0], sizes = [1, 1, 8, 4], strides = [1, 1, 1, 1]} : vector<3x3x8x4xbf16> to vector<1x1x8x4xbf16>
      %76 = vector.shape_cast %75 : vector<1x1x8x4xbf16> to vector<8x4xbf16>
      %cst_54 = arith.constant dense<0.000000e+00> : vector<8x8xf32>
      %77 = tpu.matmul %76, %74, %cst_54 {dimension_numbers = #tpu.dot_dimension_numbers<[1], [1], [0], [0], [0, 0, 1, 0], [], []>} : vector<8x4xbf16>, vector<8x4xbf16>, vector<8x8xf32> -> vector<8x8xf32>
      %78 = arith.addf %68, %77 : vector<8x8xf32>
      %c1_i32_55 = arith.constant 1 : i32
      %79 = arith.muli %7, %c1_i32_55 : i32
      %c2_i32_56 = arith.constant 2 : i32
      %80 = arith.addi %c2_i32_56, %79 : i32
      %c0_57 = arith.constant 0 : index
      %c0_58 = arith.constant 0 : index
      %81 = arith.index_cast %80 : i32 to index
      %c1_59 = arith.constant 1 : index
      %c0_60 = arith.constant 0 : index
      %82 = vector.load %arg3[%c0_57, %c0_58, %81, %c1_59, %c0_60] : memref<1x1x10x10x4xbf16, #tpu.memory_space<vmem>>, vector<1x1x1x8x4xbf16>
      %83 = vector.shape_cast %82 : vector<1x1x1x8x4xbf16> to vector<1x8x4xbf16>
      %84 = vector.shape_cast %83 : vector<1x8x4xbf16> to vector<8x4xbf16>
      %85 = vector.extract_strided_slice %4 {offsets = [2, 1, 0, 0], sizes = [1, 1, 8, 4], strides = [1, 1, 1, 1]} : vector<3x3x8x4xbf16> to vector<1x1x8x4xbf16>
      %86 = vector.shape_cast %85 : vector<1x1x8x4xbf16> to vector<8x4xbf16>
      %cst_61 = arith.constant dense<0.000000e+00> : vector<8x8xf32>
      %87 = tpu.matmul %86, %84, %cst_61 {dimension_numbers = #tpu.dot_dimension_numbers<[1], [1], [0], [0], [0, 0, 1, 0], [], []>} : vector<8x4xbf16>, vector<8x4xbf16>, vector<8x8xf32> -> vector<8x8xf32>
      %88 = arith.addf %78, %87 : vector<8x8xf32>
      %c1_i32_62 = arith.constant 1 : i32
      %89 = arith.muli %7, %c1_i32_62 : i32
      %c2_i32_63 = arith.constant 2 : i32
      %90 = arith.addi %c2_i32_63, %89 : i32
      %c0_64 = arith.constant 0 : index
      %c0_65 = arith.constant 0 : index
      %91 = arith.index_cast %90 : i32 to index
      %c2_66 = arith.constant 2 : index
      %c0_67 = arith.constant 0 : index
      %92 = vector.load %arg3[%c0_64, %c0_65, %91, %c2_66, %c0_67] : memref<1x1x10x10x4xbf16, #tpu.memory_space<vmem>>, vector<1x1x1x8x4xbf16>
      %93 = vector.shape_cast %92 : vector<1x1x1x8x4xbf16> to vector<1x8x4xbf16>
      %94 = vector.shape_cast %93 : vector<1x8x4xbf16> to vector<8x4xbf16>
      %95 = vector.extract_strided_slice %4 {offsets = [2, 2, 0, 0], sizes = [1, 1, 8, 4], strides = [1, 1, 1, 1]} : vector<3x3x8x4xbf16> to vector<1x1x8x4xbf16>
      %96 = vector.shape_cast %95 : vector<1x1x8x4xbf16> to vector<8x4xbf16>
      %cst_68 = arith.constant dense<0.000000e+00> : vector<8x8xf32>
      %97 = tpu.matmul %96, %94, %cst_68 {dimension_numbers = #tpu.dot_dimension_numbers<[1], [1], [0], [0], [0, 0, 1, 0], [], []>} : vector<8x4xbf16>, vector<8x4xbf16>, vector<8x8xf32> -> vector<8x8xf32>
      %98 = arith.addf %88, %97 : vector<8x8xf32>
      %c0_69 = arith.constant 0 : index
      %c0_70 = arith.constant 0 : index
      %99 = arith.index_cast %7 : i32 to index
      %c0_71 = arith.constant 0 : index
      %c0_72 = arith.constant 0 : index
      %100 = vector.load %arg6[%c0_69, %c0_70, %99, %c0_71, %c0_72] : memref<1x1x8x8x8xf32, #tpu.memory_space<vmem>>, vector<1x1x1x8x8xf32>
      %101 = vector.shape_cast %100 : vector<1x1x1x8x8xf32> to vector<1x8x8xf32>
      %102 = vector.shape_cast %98 : vector<8x8xf32> to vector<1x8x8xf32>
      %103 = arith.addf %101, %102 : vector<1x8x8xf32>
      %c0_73 = arith.constant 0 : index
      %c0_74 = arith.constant 0 : index
      %104 = arith.index_cast %7 : i32 to index
      %c0_75 = arith.constant 0 : index
      %c0_76 = arith.constant 0 : index
      %105 = vector.load %arg6[%c0_73, %c0_74, %104, %c0_75, %c0_76] : memref<1x1x8x8x8xf32, #tpu.memory_space<vmem>>, vector<1x1x1x8x8xf32>
      %106 = vector.shape_cast %105 : vector<1x1x1x8x8xf32> to vector<1x8x8xf32>
      %107 = vector.shape_cast %103 : vector<1x8x8xf32> to vector<1x1x1x8x8xf32>
      tpu.vector_store %arg6[%c0_73, %c0_74, %104, %c0_75, %c0_76], %107 {strides = array<i32>} : memref<1x1x8x8x8xf32, #tpu.memory_space<vmem>>, vector<1x1x1x8x8xf32>,
    }
    %c8_i32_6 = arith.constant 8 : i32
    return
  }
  func.func @transform_0(%arg0: i32, %arg1: i32, %arg2: i32) -> (i32, i32, i32, i32, i32) {
    %c1_i32 = arith.constant 1 : i32
    %0 = arith.muli %arg1, %c1_i32 : i32
    %c1_i32_0 = arith.constant 1 : i32
    %1 = arith.muli %arg2, %c1_i32_0 : i32
    %2 = arith.addi %0, %1 : i32
    %c0_i32 = arith.constant 0 : i32
    %c0_i32_1 = arith.constant 0 : i32
    %c0_i32_2 = arith.constant 0 : i32
    %c0_i32_3 = arith.constant 0 : i32
    return %arg0, %2, %c0_i32, %c0_i32_1, %c0_i32_2 : i32, i32, i32, i32, i32
  }
  func.func @transform_1(%arg0: i32, %arg1: i32, %arg2: i32) -> (i32, i32, i32, i32, i32) {
    %c0_i32 = arith.constant 0 : i32
    %c0_i32_0 = arith.constant 0 : i32
    %c0_i32_1 = arith.constant 0 : i32
    %c0_i32_2 = arith.constant 0 : i32
    %c0_i32_3 = arith.constant 0 : i32
    return %arg2, %c0_i32, %c0_i32_0, %c0_i32_1, %c0_i32_2 : i32, i32, i32, i32, i32
  }
  func.func @transform_2(%arg0: i32, %arg1: i32, %arg2: i32) -> (i32, i32, i32) {
    %c0_i32 = arith.constant 0 : i32
    %c0_i32_0 = arith.constant 0 : i32
    %c0_i32_1 = arith.constant 0 : i32
    %c0_i32_2 = arith.constant 0 : i32
    return %c0_i32, %c0_i32_0, %c0_i32_1 : i32, i32, i32
  }
  func.func @transform_3(%arg0: i32, %arg1: i32, %arg2: i32) -> (i32, i32, i32, i32, i32) {
    %c0_i32 = arith.constant 0 : i32
    %c0_i32_0 = arith.constant 0 : i32
    %c0_i32_1 = arith.constant 0 : i32
    %c0_i32_2 = arith.constant 0 : i32
    return %arg0, %arg1, %c0_i32, %c0_i32_0, %c0_i32_1 : i32, i32, i32, i32, i32
  }
}

</mosaic_0001>

<bundles_post_ra>
// kernel: _lambda_.2
= control target key start
LH: loop header
LB: loop body
LE: loop exit
PB: predicated region body
PF: predicated region fallthrough
CT: control target
= control target key end

     0   :  { %vm34_vm1 = vcmask 883712   ;;  %s76_s1 = inlined_call_operand.vmem [shape: f32[8,108], index: 1, kind: input, shape index: {}]   ;;  %s77_s2 = inlined_call_operand.vmem [shape: f32[8,108], index: 2, kind: input, shape index: {}]   ;;  %s78_s0 = inlined_call_operand.vmem [shape: f32[8,108], index: 0, kind: input, shape index: {}]   ;;  %s79_s3 = inlined_call_operand.vmem [shape: f32[8,108], index: 3, kind: output, shape index: {}]  }
   0x1   :  { %v14_v0 = vld [vmem:[%s76_s1] sm:$0xff] }
   0x2   :  { %v16_v1 = vand.u32 2147483647, %v14_v0  ;;  %v15_v11 = vmax.f32 %v14_v0, 0.0  ;;  %v31_v14 = vld [vmem:[%s77_s2] sm:$0xff] }
   0x3   :  { %v30_v16 = vld [vmem:[%s78_s0] sm:$0xff] }
   0x4   :  { %v17_v2 = vsub.f32 0.0, %v16_v1 }
   0x6   :  { %v18_v3 = vmul.f32 1.442695, %v17_v2 }
   0x8   :  { %40 = vpow2.f32 %v18_v3 }
   0xe   :  { %v41_v4 = vpop.eup %40 }
   0xf   :  { %v20_v5 = vadd.f32 1.0, %v41_v4  ;;  %v23_v6 = vmul.f32 -0.5, %v41_v4  ;;  %v26_v8 = vand.u32 2147483647, %v41_v4 }
  0x11   :  { %42 = vlog2.f32 %v20_v5  ;;  %v24_v7 = vadd.f32 1.0, %v23_v6  ;;  %vm27_vm0 = vcmp.lt.f32.partialorder %v26_v8, 0.0004427343 }
  0x13   :  { %v25_v9 = vmul.f32 %v41_v4, %v24_v7 }
  0x17   :  { %v43_v10 = vpop.eup %42 }
  0x18   :  { %v22_v12 = vmul.f32 0.6931472, %v43_v10 }
  0x1a   :  { %v28_v13 = vsel %vm27_vm0, %v25_v9, %v22_v12 }
  0x1b   :  { %v29_v15 = vadd.f32 %v28_v13, %v15_v11 }
  0x1d   :  { %v32_v17 = vmul.f32 %v31_v14, %v29_v15 }
  0x1f   :  { %v33_v18 = vadd.f32 %v32_v17, %v30_v16 }
  0x21   :  { %35 = vst.msk [vmem:[%s79_s3] sm:$0xff] %vm34_vm1, %v33_v18 }

// kernel: _lambda_.3
= control target key start
LH: loop header
LB: loop body
LE: loop exit
PB: predicated region body
PF: predicated region fallthrough
CT: control target
= control target key end

     0   :  { %s849_s12 = smov 0   ;;  %s851_s13 = smov 0   ;;  %s1018_s0 = inlined_call_operand.vmem [shape: bf16[2,10,10,10,4], index: 0, kind: input, shape index: {}]   ;;  %s1019_s1 = inlined_call_operand.vmem [shape: bf16[3,3,3,8,4], index: 1, kind: input, shape index: {}]   ;;  %s1020_s2 = inlined_call_operand.vmem [shape: f32[1,8,1], index: 2, kind: input, shape index: {}]   ;;  %s1021_s3 = inlined_call_operand.vmem [shape: f32[2,8,8,8,8], index: 3, kind: output, shape index: {}]  }
   0x1   :  { %s853_s14 = smov 0   ;;  %s855_s15 = smov 0  }
   0x2   :  { %s857_s16 = smov 0   ;;  %s859_s17 = smov 0  }
   0x3   :  { %s861_s18 = smov 0  }
   0x4 LB: > { %s25_s19 = sadd.s32 1, %s810_s15  ;;  %s28_s20 = sadd.s32 1, %s814_s16  ;;  %s822_s18 = sphi %s861_s18, %s13_s18   ;;  %s818_s17 = sphi %s859_s17, %s1027_s17   ;;  %s814_s16 = sphi %s857_s16, %s1026_s16   ;;  %s810_s15 = sphi %s855_s15, %s1025_s15   ;;  %s806_s14 = sphi %s853_s14, %s1024_s14   ;;  %s802_s13 = sphi %s851_s13, %s1023_s13   ;;  %s798_s12 = sphi %s849_s12, %s1022_s12  }
   0x5   : > { %p26_p0 = scmp.ge.s32.totalorder %s25_s19, 3  ;;  %p663_p1 = scmp.ge.s32.totalorder %s822_s18, 1 }
   0x6   : > { %p178_p2 = scmp.lt.s32.totalorder %s822_s18, 49  ;;  %s32_s21 = sadd.s32 1, %s818_s17 }
   0x7   : > { %s1029_s19 = smov (%p26_p0, %s25_s19), 0  ;;  %s1031_s20 = smov (!%p26_p0, %s28_s20), %s814_s16 }
   0x8   : > { %p179_p3 = pnand %p663_p1, %p178_p2  ;;  %p30_p4 = scmp.ge.s32.totalorder %s1031_s20, 8 }
   0x9   : > { %s216_s22 = sadd.s32 (!%p179_p3), %s798_s12, %s802_s13  ;;  %p217_p6 = scmp.lt.s32.totalorder (!%p179_p3), %s806_s14, 1 }
   0xa   : > { %s1033_s20 = smov (%p30_p4, %s1031_s20), 0  ;;  %s1035_s21 = smov (!%p30_p4, %s32_s21), %s818_s17 }
   0xb   : > { %p34_p5 = scmp.ge.s32.totalorder %s1035_s21, 2  ;;  %182 = sbr.rel (%p179_p3) target bundleno = 346 (0x15a), region = 32 }
   0xc   : > { %p219_p7 = scmp.lt.s32.totalorder (!%p179_p3), %s216_s22, 9  ;;  %p227_p8 = scmp.lt.s32.totalorder (!%p179_p3), %s798_s12, 2 }
   0xd   : > { %s1037_s21 = smov (%p34_p5, %s1035_s21), 0  ;;  %p234_p9 = scmp.lt.s32.totalorder (!%p179_p3), %s802_s13, 7 }
   0xe   : > { %p669_p10 = scmp.ne.s32.totalorder (!%p179_p3), %s798_s12, 0 }
  0x10   : > { %s1039_s14 = smov (!%p217_p6, %s806_s14), 1  ;;  %s1041_s22 = smov (!%p219_p7, %s216_s22), 9 }
  0x11   : > { %s696_s23 = smul.u32 200, %s1039_s14  ;;  %s667_s8 = sshll.u32 %s1039_s14, 6 }
  0x12   : > { %s695_s24 = smul.u32 20, %s1041_s22  ;;  %s1043_s13 = smov (!%p234_p9, %s802_s13), 7 }
  0x13   : > { %s228_s25 = scalar_select %p227_p8, %s798_s12, 2 }
  0x14   : > { %s223_s26 = sadd.s32 %s696_s23, %s695_s24  ;;  %s666_s9 = sshll.u32 %s1043_s13, 3 }
  0x15   : > { %s664_s27 = sshll.u32 %s223_s26, 2  ;;  %s697_s28 = smul.u32 36, %s228_s25 }
  0x16   : > { %s903_s4 = scalar_lea.vmem %s1018_s0, %s664_s27  ;;  %s238_s10 = sadd.s32 %s667_s8, %s666_s9 }
  0x17   : > { %s908_s7 = scalar_lea.vmem %s1019_s1, %s697_s28  ;;  %s668_s11 = sshll.u32 %s238_s10, 3 }
  0x18   : > { %s914_s24 = scalar_lea.vmem %s1021_s3, %s668_s11  ;;  %245 = sbr.rel (%p669_p10) target bundleno = 154 (0x9a), region = 36 }
  0x1d   : > { %v246_v0 = vld [vmem:[%s1020_s2] sm:$0xff]  ;;  %v828_v1 = vmov 0   ;;  %vm252_vm0 = vcmask 64512  }
  0x1e   : > { %763 = vset.pattern.permute.xlu0 %v828_v1 }
  0x1f   : > { %249 = vperm.xlu0 %763, %v246_v0  }
  0x91   : > { %v250_v2 = vpop.permute.xlu0 %249 }
  0x92   : > { %253 = vst.msk [vmem:[%s914_s24] sm:$0xff] %vm252_vm0, %v250_v2 }
  0x93   : > { %254 = vst.msk [vmem:[%s914_s24 + $0x8] sm:$0xff] %vm252_vm0, %v250_v2 }
  0x94   : > { %255 = vst.msk [vmem:[%s914_s24 + $0x10] sm:$0xff] %vm252_vm0, %v250_v2 }
  0x95   : > { %256 = vst.msk [vmem:[%s914_s24 + $0x18] sm:$0xff] %vm252_vm0, %v250_v2 }
  0x96   : > { %257 = vst.msk [vmem:[%s914_s24 + $0x20] sm:$0xff] %vm252_vm0, %v250_v2 }
  0x97   : > { %258 = vst.msk [vmem:[%s914_s24 + $0x28] sm:$0xff] %vm252_vm0, %v250_v2 }
  0x98   : > { %259 = vst.msk [vmem:[%s914_s24 + $0x30] sm:$0xff] %vm252_vm0, %v250_v2 }
  0x99   : > { %260 = vst.msk [vmem:[%s914_s24 + $0x38] sm:$0xff] %vm252_vm0, %v250_v2 }
  0x9a PF: > { %v929_v3 = vld [vmem:[%s908_s7] sm:$0xf]  ;;  %v932_v4 = vld [vmem:[%s908_s7 + $0x4] sm:$0xf]  ;;  %v935_v5 = vld [vmem:[%s908_s7 + $0x8] sm:$0xf] }
  0x9b   : > { %v938_v6 = vld [vmem:[%s908_s7 + $0xc] sm:$0xf]  ;;  %v941_v7 = vld [vmem:[%s908_s7 + $0x10] sm:$0xf]  ;;  %v944_v8 = vld [vmem:[%s908_s7 + $0x14] sm:$0xf] }
  0x9c   : > { %v947_v9 = vld [vmem:[%s908_s7 + $0x18] sm:$0xf]  ;;  %v950_v10 = vld [vmem:[%s908_s7 + $0x1c] sm:$0xf]  ;;  %v953_v11 = vld [vmem:[%s908_s7 + $0x20] sm:$0xf] }
  0x9d   : > { %s955_s12 = smov 0  }
  0x9e LB: >> { %s694_s13 = sshll.u32 %s826_s12, 3  ;;  %vm293_vm1 = vcmask 31744   ;;  %vm529_vm2 = vcmask 64512   ;;  %s275_s12 = sadd.s32 1, %s826_s12   ;;  %s826_s12 = sphi %s955_s12, %s275_s12  }
  0x9f   : >> { %s278_s14 = scalar_lea.vmem %s903_s4, %s694_s13  ;;  %s526_s27 = scalar_lea.vmem %s914_s24, %s694_s13 }
  0xa0   : >> { %v280_v12 = vld [vmem:[%s278_s14 + $0x4] sm:$0x1]  ;;  %v332_v13 = vld [vmem:[%s278_s14] sm:$0xe]  ;;  %v676_v14 = vld [vmem:[%s278_s14 + $0x8] sm:$0xf] }
  0xa1   : >> { %v284_v15 = vunpack.c.l.b16 %v280_v12  ;;  %v334_v16 = vunpack.c.l.b16 %v332_v13  ;;  %v366_v17 = vsel %vm293_vm1, %v676_v14, 0  ;;  %v279_v18 = vld [vmem:[%s278_s14] sm:$0xf]  ;;  %v678_v19 = vld [vmem:[%s278_s14 + $0x8] sm:$0xf]  ;;  %p272_p11 = scmp.ge.s32.totalorder %s275_s12, 8  }
  0xa2   : >> { %375 = vmatpush.bf16.xpose.msra.mxu3 %v366_v17  ;;  %v283_v20 = vunpack.c.l.b16 %v279_v18  ;;  %v317_v21 = vsel %vm293_vm1, %v279_v18, 0  ;;  %v679_v22 = vld [vmem:[%s278_s14 + $0xc] sm:$0x1]  ;;  %v386_v23 = vunpack.c.l.b16 %v678_v19  ;;  %v684_v24 = vld [vmem:[%s278_s14 + $0x10] sm:$0xf] }
  0xa3   : >> { %v335_v25 = vpack.c.b16 %v284_v15, %v334_v16  ;;  %326 = vmatpush.bf16.xpose.msra.mxu1 %v317_v21  ;;  %v387_v26 = vunpack.c.l.b16 %v679_v22  ;;  %v686_v27 = vld [vmem:[%s278_s14 + $0x10] sm:$0xf]  ;;  %v687_v28 = vld [vmem:[%s278_s14 + $0x14] sm:$0x1]  ;;  %v681_v32 = vld [vmem:[%s278_s14 + $0x8] sm:$0xe] }
  0xa4   : >> { %v285_v29 = vpack.c.b16 %v284_v15, %v283_v20  ;;  %v470_v30 = vunpack.c.l.b16 %v686_v27  ;;  %v471_v31 = vunpack.c.l.b16 %v687_v28  ;;  %v689_v33 = vld [vmem:[%s278_s14 + $0x10] sm:$0xe]  ;;  %v450_v36 = vsel %vm293_vm1, %v684_v24, 0 }
  0xa5   : >> { %v336_v34 = vrot.slane %v335_v25, 1  ;;  %v388_v35 = vpack.c.b16 %v387_v26, %v386_v23  ;;  %v418_v37 = vunpack.c.l.b16 %v681_v32  ;;  %v502_v41 = vunpack.c.l.b16 %v689_v33 }
  0xa6   : >> { %v287_v38 = vshrl.u32 %v285_v29, 16  ;;  %v289_v39 = vshll.u32 %v285_v29, 16  ;;  %v472_v40 = vpack.c.b16 %v471_v31, %v470_v30 }
  0xa7   : >> { %v341_v42 = vsel %vm293_vm1, %v336_v34, 0  ;;  %v390_v43 = vshrl.u32 %v388_v35, 16  ;;  %v392_v44 = vshll.u32 %v388_v35, 16  ;;  %v419_v45 = vpack.c.b16 %v387_v26, %v418_v37 }
  0xa8   : >> { %350 = vmatpush.bf16.xpose.msra.mxu2 %v341_v42  ;;  %v291_v46 = vrot.slane %v289_v39, 1  ;;  %v474_v47 = vshrl.u32 %v472_v40, 16  ;;  %v476_v48 = vshll.u32 %v472_v40, 16  ;;  %v503_v53 = vpack.c.b16 %v471_v31, %v502_v41  ;;  %v527_v31 = vld [vmem:[%s526_s27] sm:$0xff] }
  0xa9   : >> { %677 = vmatmul.msk.bf16.vlgmr.msra.gmra.mxu3 %vm293_vm1, %v938_v6  ;;  %v394_v49 = vrot.slane %v392_v44, 1  ;;  %v420_v50 = vrot.slane %v419_v45, 1 }
  0xaa   : >> { %v292_v51 = vor.u32 %v291_v46, %v287_v38  ;;  %673 = vmatmul.msk.bf16.vlgmr.msra.gmra.mxu1 %vm293_vm1, %v929_v3  ;;  %v478_v52 = vrot.slane %v476_v48, 1  ;;  %v504_v60 = vrot.slane %v503_v53, 1 }
  0xab   : >> { %v395_v54 = vor.u32 %v394_v49, %v390_v43  ;;  %v425_v55 = vsel %vm293_vm1, %v420_v50, 0 }
  0xac   : >> { %v298_v56 = vsel %vm293_vm1, %v292_v51, 0  ;;  %v479_v57 = vor.u32 %v478_v52, %v474_v47  ;;  %434 = vmatpush.bf16.xpose.msrb.mxu1 %v425_v55  ;;  %v509_v61 = vsel %vm293_vm1, %v504_v60, 0 }
  0xad   : >> { %307 = vmatpush.bf16.xpose.msra.mxu0 %v298_v56  ;;  %v400_v58 = vsel %vm293_vm1, %v395_v54, 0 }
  0xae   : >> { %v484_v59 = vsel %vm293_vm1, %v479_v57, 0 }
  0xaf   : >> { %674 = vmatmul.msk.bf16.vlgmr.msra.gmra.mxu2 %vm293_vm1, %v935_v5  ;;  %493 = vmatpush.bf16.xpose.msrb.mxu3 %v484_v59 }
  0xb0   : >> { %459 = vmatpush.bf16.xpose.msrb.mxu2 %v450_v36 }
  0xb4   : >> { %672 = vmatmul.msk.bf16.vlgmr.msra.gmra.mxu0 %vm293_vm1, %v932_v4 }
  0xb5   : >> { %409 = vmatpush.bf16.xpose.msrb.mxu0 %v400_v58 }
  0xb9   : >> { %688 = vmatmul.msk.bf16.vlgmr.msrb.gmra.mxu3 %vm293_vm1, %v950_v10 }
  0xba   : >> { %682 = vmatmul.msk.bf16.vlgmr.msrb.gmra.mxu1 %vm293_vm1, %v944_v8 }
  0xbd   : >> { %518 = vmatpush.bf16.xpose.msra.mxu0 %v509_v61 }
  0xbf   : >> { %685 = vmatmul.msk.bf16.vlgmr.msrb.gmra.mxu2 %vm293_vm1, %v947_v9 }
  0xc4   : >> { %680 = vmatmul.msk.bf16.vlgmr.msrb.gmra.mxu0 %vm293_vm1, %v941_v7 }
  0xd4   : >> { %690 = vmatmul.msk.bf16.vlgmr.msra.gmra.mxu0 %vm293_vm1, %v953_v11 }
 0x127   : >> { %v328_v62 = vpop.f32.mrf.mxu1 }
 0x12c   : >> { %v377_v63 = vpop.f32.mrf.mxu3 }
 0x12f   : >> { %v330_v0 = vpop.f32.mrf.mxu1 }
 0x131   : >> { %v309_v1 = vpop.f32.mrf.mxu0 }
 0x132   : >> { %v352_v2 = vpop.f32.mrf.mxu2  ;;  %v329_v15 = vadd.f32 %v328_v62, %v309_v1 }
 0x134   : >> { %v379_v12 = vpop.f32.mrf.mxu3  ;;  %v356_v18 = vadd.f32 %v352_v2, %v329_v15 }
 0x136   : >> { %v381_v21 = vadd.f32 %v377_v63, %v356_v18 }
 0x137   : >> { %v436_v13 = vpop.f32.mrf.mxu1 }
 0x139   : >> { %v311_v14 = vpop.f32.mrf.mxu0 }
 0x13a   : >> { %v354_v16 = vpop.f32.mrf.mxu2 }
 0x13c   : >> { %v495_v17 = vpop.f32.mrf.mxu3 }
 0x13f   : >> { %v438_v19 = vpop.f32.mrf.mxu1 }
 0x141   : >> { %v411_v20 = vpop.f32.mrf.mxu0 }
 0x142   : >> { %v461_v22 = vpop.f32.mrf.mxu2  ;;  %v415_v23 = vadd.f32 %v411_v20, %v381_v21 }
 0x144   : >> { %v497_v24 = vpop.f32.mrf.mxu3  ;;  %v440_v25 = vadd.f32 %v436_v13, %v415_v23 }
 0x146   : >> { %v465_v28 = vadd.f32 %v461_v22, %v440_v25 }
 0x148   : >> { %v499_v29 = vadd.f32 %v495_v17, %v465_v28 }
 0x149   : >> { %v413_v26 = vpop.f32.mrf.mxu0 }
 0x14a   : >> { %v463_v27 = vpop.f32.mrf.mxu2 }
 0x151   : >> { %v520_v30 = vpop.f32.mrf.mxu0 }
 0x152   : >> { %v524_v32 = vadd.f32 %v520_v30, %v499_v29 }
 0x154   : >> { %v528_v33 = vadd.f32 %v527_v31, %v524_v32 }
 0x155   : > { %274 = sbr.rel (!%p272_p11) target bundleno = 158 (0x9e), region = 80 }
 0x156   : >> { %530 = vst.msk [vmem:[%s526_s27] sm:$0xff] %vm529_vm2, %v528_v33 }
 0x159   : >> { %v522_v34 = vpop.f32.mrf.mxu0 }
 0x15a PF: > { %s13_s18 = sadd.s32 1, %s822_s18   ;;  %s1022_s12 = smov %s810_s15 }
 0x15b   : > { %p10_p12 = scmp.ge.s32.totalorder %s13_s18, 50   ;;  %s1023_s13 = smov %s814_s16 }
 0x15c   : > { %s1024_s14 = smov %s818_s17  ;;  %s1025_s15 = smov %s1029_s19 }
 0x15d   : > { %s1026_s16 = smov %s1033_s20  ;;  %s1027_s17 = smov %s1037_s21 }
 0x15e   :  { %12 = sbr.rel (!%p10_p12) target bundleno = 4 (0x4), region = 91 }

</bundles_post_ra>
